<compile_context>
chip_gen: v7x
topology: tpu7x:2x2x1
jax: 0.10.0
libtpu: 0.0.40
codegen_flags: <defaults>
</compile_context>

<pallas_src>
from functools import partial

import jax
import jax.numpy as jnp
from jax.experimental import pallas as pl
from jax.experimental.pallas import tpu as pltpu


def _round_up(n: int, m: int) -> int:
    return ((n + m - 1) // m) * m


def _head_linear_kernel(choice_ref, x_ref, w_ref, b_ref, o_ref):
    # choice_ref: scalar-prefetch ref (already consumed by the index_maps).
    # x_ref: (TM, D_in_p)   w_ref: (D_in_p, D_out_p)   b_ref: (1, D_out_p)
    acc = jnp.dot(x_ref[...], w_ref[...], preferred_element_type=jnp.float32)
    o_ref[...] = (acc + b_ref[...]).astype(o_ref.dtype)


@partial(jax.jit, static_argnames=("d_out",))
def task_multi_net_forward(x, choice, w_padded, b_padded, *, d_out):
    """y = x @ W[choice] + b[choice] (logical shapes), computed in Pallas.

    x:         (B, D_in)                 float32
    choice:    ()  or (1,)               int32 device array (head selector)
    w_padded:  (H, D_in_p, D_out_p)      lane/tile-padded stacked weights
    b_padded:  (H, 1,      D_out_p)      lane-padded stacked biases
    d_out:     logical output feature count (static)
    """
    B, D_in = x.shape
    H, D_in_p, D_out_p = w_padded.shape

    # Batch tile: multiple of 8 sublanes; cap at 128 (MXU row granularity).
    TM = 128 if B >= 128 else _round_up(max(B, 1), 8)
    B_p = _round_up(B, TM)

    # Zero-pad activations to the tiled/lane-dense kernel shapes.
    if (B_p != B) or (D_in_p != D_in):
        x = jnp.pad(x, ((0, B_p - B), (0, D_in_p - D_in)))

    # Clamp the head index before it drives a DMA (free insurance vs. OOB).
    choice_arr = jnp.clip(jnp.asarray(choice, jnp.int32).reshape(-1)[:1], 0, H - 1)

    grid_spec = pltpu.PrefetchScalarGridSpec(
        num_scalar_prefetch=1,
        grid=(B_p // TM,),
        in_specs=[
            # x: one batch tile per grid step.
            pl.BlockSpec((TM, D_in_p), lambda i, c: (i, 0)),
            # Selected head's weight: same block every step -> stays resident.
            pl.BlockSpec((pl.Squeezed(), D_in_p, D_out_p),
                         lambda i, c: (c[0], 0, 0)),
            # Selected head's bias.
            pl.BlockSpec((pl.Squeezed(), 1, D_out_p),
                         lambda i, c: (c[0], 0, 0)),
        ],
        out_specs=pl.BlockSpec((TM, D_out_p), lambda i, c: (i, 0)),
    )

    y_p = pl.pallas_call(
        _head_linear_kernel,
        out_shape=jax.ShapeDtypeStruct((B_p, D_out_p), x.dtype),
        grid_spec=grid_spec,
        compiler_params=pltpu.CompilerParams(
            dimension_semantics=("parallel",),
        ),
    )(choice_arr, x, w_padded, b_padded)

    # Slice back to the logical output shape.
    return y_p[:B, :d_out]


def make_params(key, num_heads, d_in, d_out, dtype=jnp.float32):
    """Deterministic per-head Linear params, stacked (logical shapes).

    PyTorch nn.Linear stores weight as (out, in) and computes x @ W.T + b; we
    store the transposed weight (in, out) so the kernel does x @ W + b with
    identical semantics.
    """
    kw, kb = jax.random.split(key)
    bound = 1.0 / jnp.sqrt(d_in)
    w = jax.random.uniform(kw, (num_heads, d_in, d_out), dtype,
                           minval=-bound, maxval=bound)
    b = jax.random.uniform(kb, (num_heads, d_out), dtype,
                           minval=-bound, maxval=bound)
    return w, b


def pad_params(w, b):
    """Zero-pad stacked params to lane/tile-dense kernel shapes.

    (H, D_in, D_out) -> (H, ceil128(D_in), ceil128(D_out))
    (H, D_out)       -> (H, 1, ceil128(D_out))
    Zero padding is exact: padded input rows of W multiply zero-padded x
    columns, and padded output columns are sliced away in the wrapper.
    """
    H, d_in, d_out = w.shape
    d_in_p = _round_up(d_in, 128)
    d_out_p = _round_up(d_out, 128)
    w_p = jnp.pad(w, ((0, 0), (0, d_in_p - d_in), (0, d_out_p - d_out)))
    b_p = jnp.pad(b, ((0, 0), (0, d_out_p - d_out)))[:, None, :]
    return w_p, b_p


if __name__ == "__main__":
    key = jax.random.PRNGKey(0)
    k_x, k_p = jax.random.split(key)

    B, D_IN, D_OUT, NUM_HEADS = 8, 32, 16, 3
    x = jax.random.normal(k_x, (B, D_IN), dtype=jnp.float32)
    stacked_w, stacked_b = make_params(k_p, NUM_HEADS, D_IN, D_OUT)
    w_padded, b_padded = pad_params(stacked_w, stacked_b)

    choice = jnp.array(1, dtype=jnp.int32)  # select head "1"
    y = task_multi_net_forward(x, choice, w_padded, b_padded, d_out=D_OUT)
    jax.block_until_ready(y)

    # Reference check (plain JAX) for the same head on the logical params.
    c = int(choice)
    y_ref = x @ stacked_w[c] + stacked_b[c]
    assert y.shape == (B, D_OUT)
    assert jnp.allclose(y, y_ref, atol=1e-5, rtol=1e-5)

    print("KERNEL_OK")
</pallas_src>

<mosaic_0001>
module attributes {stable_mosaic.version = 11 : i64} {
  func.func @_head_linear_kernel(%arg0: i32, %arg1: memref<1xi32, #tpu.memory_space<smem>>, %arg2: memref<8x128xf32, #tpu.memory_space<vmem>>, %arg3: memref<1x128x128xf32, #tpu.memory_space<vmem>>, %arg4: memref<1x1x128xf32, #tpu.memory_space<vmem>>, %arg5: memref<8x128xf32, #tpu.memory_space<vmem>>) attributes {dimension_semantics = [#tpu.dimension_semantics<parallel>], iteration_bounds = array<i64: 1>, scalar_prefetch = 1 : i64, scratch_operands = 0 : i64, tpu.core_type = #tpu.core_type<tc>, window_params = [{transform_indices = @transform_0, window_bounds = array<i64: 8, 128>}, {transform_indices = @transform_1, window_bounds = array<i64: 1, 128, 128>}, {transform_indices = @transform_2, window_bounds = array<i64: 1, 1, 128>}, {transform_indices = @transform_3, window_bounds = array<i64: 8, 128>}]} {
    %c0 = arith.constant 0 : index
    %c0_0 = arith.constant 0 : index
    %0 = vector.load %arg2[%c0, %c0_0] : memref<8x128xf32, #tpu.memory_space<vmem>>, vector<8x128xf32>
    %c0_1 = arith.constant 0 : index
    %c0_2 = arith.constant 0 : index
    %c0_3 = arith.constant 0 : index
    %1 = vector.load %arg3[%c0_1, %c0_2, %c0_3] : memref<1x128x128xf32, #tpu.memory_space<vmem>>, vector<1x128x128xf32>
    %2 = vector.shape_cast %1 : vector<1x128x128xf32> to vector<128x128xf32>
    %cst = arith.constant dense<0.000000e+00> : vector<8x128xf32>
    %3 = tpu.matmul %0, %2, %cst {dimension_numbers = #tpu.dot_dimension_numbers<[1], [0], [0], [1], [0, 0, 1, 1], [], []>} : vector<8x128xf32>, vector<128x128xf32>, vector<8x128xf32> -> vector<8x128xf32>
    %c0_4 = arith.constant 0 : index
    %c0_5 = arith.constant 0 : index
    %c0_6 = arith.constant 0 : index
    %4 = vector.load %arg4[%c0_4, %c0_5, %c0_6] : memref<1x1x128xf32, #tpu.memory_space<vmem>>, vector<1x1x128xf32>
    %5 = vector.shape_cast %4 : vector<1x1x128xf32> to vector<1x128xf32>
    %6 = vector.broadcast %5 : vector<1x128xf32> to vector<8x128xf32>
    %7 = arith.addf %3, %6 : vector<8x128xf32>
    %c0_7 = arith.constant 0 : index
    %c0_8 = arith.constant 0 : index
    %8 = vector.load %arg5[%c0_7, %c0_8] : memref<8x128xf32, #tpu.memory_space<vmem>>, vector<8x128xf32>
    tpu.vector_store %arg5[%c0_7, %c0_8], %7 {strides = array<i32>} : memref<8x128xf32, #tpu.memory_space<vmem>>, vector<8x128xf32>,
    return
  }
  func.func @transform_0(%arg0: i32, %arg1: memref<1xi32, #tpu.memory_space<smem>>) -> (i32, i32) {
    %c0_i32 = arith.constant 0 : i32
    %c0_i32_0 = arith.constant 0 : i32
    return %arg0, %c0_i32 : i32, i32
  }
  func.func @transform_1(%arg0: i32, %arg1: memref<1xi32, #tpu.memory_space<smem>>) -> (i32, i32, i32) {
    %c0 = arith.constant 0 : index
    %0 = memref.load %arg1[%c0] : memref<1xi32, #tpu.memory_space<smem>>
    %c0_i32 = arith.constant 0 : i32
    %c0_i32_0 = arith.constant 0 : i32
    %c0_i32_1 = arith.constant 0 : i32
    return %0, %c0_i32, %c0_i32_0 : i32, i32, i32
  }
  func.func @transform_2(%arg0: i32, %arg1: memref<1xi32, #tpu.memory_space<smem>>) -> (i32, i32, i32) {
    %c0 = arith.constant 0 : index
    %0 = memref.load %arg1[%c0] : memref<1xi32, #tpu.memory_space<smem>>
    %c0_i32 = arith.constant 0 : i32
    %c0_i32_0 = arith.constant 0 : i32
    %c0_i32_1 = arith.constant 0 : i32
    return %0, %c0_i32, %c0_i32_0 : i32, i32, i32
  }
  func.func @transform_3(%arg0: i32, %arg1: memref<1xi32, #tpu.memory_space<smem>>) -> (i32, i32) {
    %c0_i32 = arith.constant 0 : i32
    %c0_i32_0 = arith.constant 0 : i32
    return %arg0, %c0_i32 : i32, i32
  }
}

</mosaic_0001>

<bundles_post_ra>
// kernel: task_multi_net_forward.1
= control target key start
LH: loop header
LB: loop body
LE: loop exit
PB: predicated region body
PF: predicated region fallthrough
CT: control target
= control target key end

     0   :  { %10 = vsyncpa [#allocation5], 0  ;;  %s370_s0 = inlined_call_operand.<no memory space> [shape: s32[1], index: 0, kind: input, shape index: {}]   ;;  %s371_s1 = inlined_call_operand.vmem [shape: f32[8,128], index: 1, kind: input, shape index: {}]   ;;  %s372_s2 = inlined_call_operand.hbm [shape: f32[3,128,128], index: 2, kind: input, shape index: {}]   ;;  %s373_s3 = inlined_call_operand.vmem [shape: f32[3,1,128], index: 3, kind: input, shape index: {}]   ;;  %s374_s4 = inlined_call_operand.hbm [shape: f32[8,128], index: 4, kind: output, shape index: {}]  }
   0x1   :  { %11 = vsyncpa [#allocation6], 0  ;;  %s168_s17 = sshll.u32 %s370_s0, 11  ;;  %s302_s21 = smov [#allocation4]  }
   0x2   :  { %s22_s20 = scalar_lea.hbm %s372_s2, %s168_s17  ;;  %s23_s22 = sshll.u32 %s302_s21, 4  ;;  %s24_s22 = int_to_ptr.vmem [resolvable:$true] %s23_s22 }
   0x3   :  { %s252_s23 = scalar_lea.hbm %s22_s20, 2048  ;;  %s254_s26 = scalar_lea.hbm %s372_s2, 6144 }
   0x4   :  { %p253_p0 = scmp.ne.s32.totalorder %s22_s20, %s252_s23  ;;  %p255_p1 = scmp.lt.u32.totalorder %s22_s20, %s372_s2 }
   0x5   :  { %p256_p2 = scmp.lt.u32.totalorder %s254_s26, %s252_s23  ;;  %p258_p4 = scmp.lt.u32.totalorder %s252_s23, %s22_s20 }
   0x7   :  { %p257_p3 = por %p256_p2, %p255_p1 }
   0x9   :  { %p259_p5 = por %p258_p4, %p257_p3 }
   0xb   :  { %p260_p6 = pnand %p259_p5, %p253_p0 }
   0xd   :  { %263 = shalt.err (!%p260_p6)
}
   0xe   :  { %s264_s29 = scalar_lea.vmem %s24_s22, 2048  ;;  %p269_p8 = scmp.lt.s32.totalorder %s24_s22, %s24_s22 }
   0xf   :  { %p265_p7 = scmp.ne.s32.totalorder %s24_s22, %s264_s29  ;;  %p270_p9 = scmp.lt.s32.totalorder %s264_s29, %s264_s29 }
  0x11   :  { %p271_p10 = por %p270_p9, %p269_p8 }
  0x13   :  { %p272_p11 = pnand %p271_p10, %p265_p7 }
  0x15   :  { %275 = shalt.err (!%p272_p11)
}
  0x16   :  { %s303_s30 = smov 128   ;;  %s304_s5 = smov 8  }
  0x17   :  { %29 = dma.hbm_to_vmem [thread:$0]  %s22_s20, 2048, %s24_s22, [#allocation5], %s303_s30, %s303_s30, %s304_s5  }
  0x18   :  { %298 = dma.done.wait [#allocation5], 2048  }
  0x19   :  { %299 = vsyncadd [#allocation5], 4294965248  ;;  %v305_v0 = vmov 0.0|0.0   ;;  %vm306_vm0 = vmmov 0   ;;  %v307_v1 = vmov 0.0   ;;  %v51_v2 = vld [vmem:[#allocation4] sm:$0xff] }
  0x1a   :  { %221 = vmatprep.subr.bf16.mxu0 %v305_v0  ;;  %218 = vmatprep.mubr.msk.f32.mxu0 %vm306_vm0, %v307_v1  ;;  %v52_v3 = vld [vmem:[#allocation4 + $0x8] sm:$0xff]  ;;  %v53_v4 = vld [vmem:[#allocation4 + $0x10] sm:$0xff]  ;;  %v54_v6 = vld [vmem:[#allocation4 + $0x18] sm:$0xff]  ;;  %p46_p12 = scmp.lt.s32.totalorder %s370_s0, 2  ;;  %s308_s14 = smov [#allocation7]  }
  0x1b   :  { %v222_v5 = vpack.c.bf16 %v52_v3, %v51_v2  ;;  %v225_v7 = vpack.c.bf16 %v54_v6, %v53_v4  ;;  %v55_v8 = vld [vmem:[#allocation4 + $0x20] sm:$0xff]  ;;  %v56_v9 = vld [vmem:[#allocation4 + $0x28] sm:$0xff]  ;;  %v57_v11 = vld [vmem:[#allocation4 + $0x30] sm:$0xff]  ;;  %s151_s15 = sshll.u32 %s308_s14, 4  ;;  %s152_s15 = int_to_ptr.vmem [resolvable:$true] %s151_s15 }
  0x1c   :  { %v228_v10 = vpack.c.bf16 %v56_v9, %v55_v8  ;;  %v58_v12 = vld [vmem:[#allocation4 + $0x38] sm:$0xff]  ;;  %v59_v14 = vld [vmem:[#allocation4 + $0x40] sm:$0xff]  ;;  %v60_v15 = vld [vmem:[#allocation4 + $0x48] sm:$0xff]  ;;  %s376_s0 = smov (!%p46_p12, %s370_s0), 2  ;;  %p281_p0 = scmp.lt.s32.totalorder %s152_s15, %s152_s15 }
  0x1d   :  { %223 = vmatpush3.bf16.msra.mxu0 %v222_v5  ;;  %v231_v13 = vpack.c.bf16 %v58_v12, %v57_v11  ;;  %v234_v16 = vpack.c.bf16 %v60_v15, %v59_v14  ;;  %v61_v17 = vld [vmem:[#allocation4 + $0x50] sm:$0xff]  ;;  %v62_v18 = vld [vmem:[#allocation4 + $0x58] sm:$0xff]  ;;  %v63_v20 = vld [vmem:[#allocation4 + $0x60] sm:$0xff]  ;;  %s48_s13 = scalar_lea.vmem %s373_s3, %s376_s0 }
  0x1e   :  { %224 = vmatprep.subr.bf16.mxu0 %v305_v0  ;;  %v237_v19 = vpack.c.bf16 %v62_v18, %v61_v17  ;;  %v64_v21 = vld [vmem:[#allocation4 + $0x68] sm:$0xff]  ;;  %v65_v23 = vld [vmem:[#allocation4 + $0x70] sm:$0xff]  ;;  %v66_v24 = vld [vmem:[#allocation4 + $0x78] sm:$0xff] }
  0x1f   :  { %v240_v22 = vpack.c.bf16 %v64_v21, %v63_v20  ;;  %v243_v25 = vpack.c.bf16 %v66_v24, %v65_v23  ;;  %v50_v26 = vld [vmem:[%s371_s1] sm:$0xff]  ;;  %s276_s1 = scalar_lea.vmem %s152_s15, 128 }
  0x20   :  { %v167_v27 = vld [vmem:[%s48_s13] ss:$0 sm:$0xff]  ;;  %p277_p13 = scmp.ne.s32.totalorder %s152_s15, %s276_s1  ;;  %p282_p1 = scmp.lt.s32.totalorder %s276_s1, %s276_s1 }
  0x21   :  { %226 = vmatpush3.bf16.msra.mxu0 %v225_v7 }
  0x22   :  { %227 = vmatprep.subr.bf16.mxu0 %v305_v0  ;;  %p283_p2 = por %p282_p1, %p281_p0 }
  0x24   :  { %p284_p3 = pnand %p283_p2, %p277_p13 }
  0x25   :  { %229 = vmatpush3.bf16.msra.mxu0 %v228_v10 }
  0x26   :  { %230 = vmatprep.subr.bf16.mxu0 %v305_v0 }
  0x29   :  { %232 = vmatpush3.bf16.msra.mxu0 %v231_v13 }
  0x2a   :  { %233 = vmatprep.subr.bf16.mxu0 %v305_v0 }
  0x2d   :  { %235 = vmatpush3.bf16.msra.mxu0 %v234_v16 }
  0x2e   :  { %236 = vmatprep.subr.bf16.mxu0 %v305_v0 }
  0x31   :  { %238 = vmatpush3.bf16.msra.mxu0 %v237_v19 }
  0x32   :  { %239 = vmatprep.subr.bf16.mxu0 %v305_v0 }
  0x35   :  { %241 = vmatpush3.bf16.msra.mxu0 %v240_v22 }
  0x36   :  { %242 = vmatprep.subr.bf16.mxu0 %v305_v0 }
  0x39   :  { %244 = vmatpush3.bf16.msra.mxu0 %v243_v25 }
  0x3c   :  { %219 = vmatmul.mubr.f32.vlgmr.msra.gmra.mrb[0].mxu0 %v50_v26 }
 0x10f   :  { %v140_v28 = vpop.f32.mrb[0].mxu0 }
 0x110   :  { %v141_v29 = vadd.f32 %v167_v27, %v140_v28  ;;  %v220_v30 = vpop.f32.mrb[1].mxu0 }
 0x112   :  { %144 = vst [vmem:[#allocation7] sm:$0xff] %v141_v29 }
 0x113   :  { %287 = shalt.err (!%p284_p3)
}
 0x114   :  { %s288_s18 = scalar_lea.hbm %s374_s4, 128 }
 0x115   :  { %p289_p4 = scmp.ne.s32.totalorder %s374_s4, %s288_s18  ;;  %p292_p5 = scmp.lt.u32.totalorder %s288_s18, %s374_s4 }
 0x117   :  { %p294_p6 = pnand %p292_p5, %p289_p4 }
 0x119   :  { %297 = shalt.err (!%p294_p6)
}
 0x11a   :  { %154 = dma.vmem_to_hbm [thread:$0]  %s152_s15, 128, %s374_s4, [#allocation6]  }
 0x11b   :  { %300 = dma.done.wait [#allocation6], 128  }
 0x11c   :  { %301 = vsyncadd [#allocation6], 4294967168 }
 0x11d   :  { %158 = vsyncpa [#allocation5], 1 }
 0x11e   :  { %159 = vsyncpa [#allocation6], 1 }

</bundles_post_ra>
